<compile_context>
chip_gen: v7x
topology: tpu7x:2x2x1
jax: 0.10.0
libtpu: 0.0.40
codegen_flags: <defaults>
</compile_context>

<pallas_src>
import jax
import jax.numpy as jnp
from jax import lax
from jax.experimental import pallas as pl
from jax.experimental.pallas import tpu as pltpu


def _vmem_budget_bytes():
    """Generation-aware VMEM budget: ~3/4 of physical VMEM (v5e/v6e 128 MiB ->
    96 MiB, v7x 64 MiB -> 48 MiB). Conservative fallback if the query fails."""
    cap = None
    try:
        cap = getattr(pltpu.get_tpu_info(), "vmem_capacity_bytes", None)
    except Exception:
        cap = None
    if not cap:
        cap = 64 * 1024 * 1024
    return int(cap) * 3 // 4


def _pick_tile(n, candidates, cap=None):
    """Largest candidate dividing n; else the largest divisor of n that is a
    multiple of 8 (and <= cap); last resort n itself (correct, maybe large)."""
    for c in candidates:
        if n % c == 0 and (cap is None or c <= cap):
            return c
    limit = n if cap is None else min(n, cap)
    for c in range(limit - (limit % 8), 7, -8):
        if n % c == 0:
            return c
    return n


def _layernorm(v, gamma, beta, eps=1e-5):
    mu = jnp.mean(v, axis=-1, keepdims=True)
    var = jnp.mean(jnp.square(v - mu), axis=-1, keepdims=True)
    return (v - mu) * lax.rsqrt(var + eps) * gamma + beta


_SQRT_2_OVER_PI = 0.7978845608028654


def _gelu_tanh_bf16(x_f32):
    # tanh-approx GELU evaluated in bf16 (the result feeds a bf16 MXU matmul
    # anyway, so the extra rounding is on par with existing bf16 casts); the
    # transcendental runs on the EUP, the polynomial on the bf16 VPU.
    x = x_f32.astype(jnp.bfloat16)
    inner = _SQRT_2_OVER_PI * (x + 0.044715 * (x * x * x))
    return 0.5 * x * (1.0 + jnp.tanh(inner))


# ---------------------------------------------------------------------------
# Kernel 1: seq-layernorm + causal token-mixing matmul + residual
#   x1[b, i, :] = sum_{k<=i} Wc[i, k] * LN_seq(x)[b, k, :] + bc[i] + x[b, i, :]
# grid = (B, T/tt).  The full (T, D) x panel is resident per batch; LN is
# computed once per batch (i == 0) into a bf16 VMEM panel; each step is one
# (tt, T) @ (T, D) MXU matmul against a row panel of tril(Wc).
# ---------------------------------------------------------------------------
def _token_mix_kernel(x_ref, wc_ref, bc_ref, gs_ref, bs_ref, o_ref, ln_ref):
    i = pl.program_id(1)
    tt = o_ref.shape[1]

    @pl.when(i == 0)
    def _():
        xb = x_ref[0].astype(jnp.float32)                       # (T, D)
        ln_ref[...] = _layernorm(xb, gs_ref[...], bs_ref[...]).astype(jnp.bfloat16)

    # Causal mixing: wc row panel is pre-masked (tril), bf16 MXU, f32 result.
    mix = jnp.dot(wc_ref[...], ln_ref[...],
                  preferred_element_type=jnp.float32)           # (tt, D)

    start = pl.multiple_of(i * tt, tt)
    res = x_ref[0, pl.ds(start, tt), :].astype(jnp.float32)     # residual slice
    o_ref[0] = (mix + bc_ref[...] + res).astype(o_ref.dtype)


def _token_mix(x, wc, bc, gs, bs, *, vmem_limit):
    B, T, D = x.shape
    tt = _pick_tile(T, (256, 128, 64, 32, 16, 8), cap=256)
    nt = T // tt

    return pl.pallas_call(
        _token_mix_kernel,
        out_shape=jax.ShapeDtypeStruct((B, T, D), x.dtype),
        grid=(B, nt),
        in_specs=[
            pl.BlockSpec((1, T, D), lambda b, i: (b, 0, 0)),    # x panel, resident per b
            pl.BlockSpec((tt, T), lambda b, i: (i, 0)),         # tril(Wc) row panel (bf16)
            pl.BlockSpec((tt, 1), lambda b, i: (i, 0)),         # conv bias rows
            pl.BlockSpec((1, D), lambda b, i: (0, 0)),          # seq LN gamma
            pl.BlockSpec((1, D), lambda b, i: (0, 0)),          # seq LN beta
        ],
        out_specs=pl.BlockSpec((1, tt, D), lambda b, i: (b, i, 0)),
        scratch_shapes=[pltpu.VMEM((T, D), jnp.bfloat16)],      # LN(x) panel
        compiler_params=pltpu.CompilerParams(
            dimension_semantics=("parallel", "arbitrary"),
            vmem_limit_bytes=vmem_limit),
    )(x, wc, bc, gs, bs)


# ---------------------------------------------------------------------------
# Kernel 2: patch-layernorm + FeedForward (Linear -> GELU -> Linear) + residual
# Token-independent, so B is folded into the row dim (rows = B*T).
# grid = (rows/tm, H/th); when the weights fit VMEM th == H (one step, weights
# resident and fetched once thanks to the constant index map); otherwise H is
# the streamed reduction axis with an f32 accumulator.
# ---------------------------------------------------------------------------
def _channel_ff_kernel(x_ref, gp_ref, bp_ref, w1_ref, b1_ref, w2_ref, b2_ref,
                       o_ref, xln_ref, acc_ref):
    h = pl.program_id(1)

    @pl.when(h == 0)
    def _():
        xv = x_ref[...].astype(jnp.float32)
        xln_ref[...] = _layernorm(xv, gp_ref[...], bp_ref[...]).astype(jnp.bfloat16)
        acc_ref[...] = jnp.zeros_like(acc_ref)

    hid = jnp.dot(xln_ref[...], w1_ref[...],
                  preferred_element_type=jnp.float32) + b1_ref[...]   # (tm, th)
    g = _gelu_tanh_bf16(hid)                                          # bf16
    acc_ref[...] += jnp.dot(g, w2_ref[...],
                            preferred_element_type=jnp.float32)       # (tm, D)

    @pl.when(h == pl.num_programs(1) - 1)
    def _():
        res = x_ref[...].astype(jnp.float32)
        o_ref[...] = (acc_ref[...] + b2_ref[...] + res).astype(o_ref.dtype)


def _select_ff_tiles(M, D, H, x_bytes, budget, tm_override=None, th_override=None):
    tm_cands = [c for c in (1024, 512, 256, 128, 64, 32, 16, 8) if M % c == 0]
    if not tm_cands:
        tm_cands = [_pick_tile(M, (1024, 512, 256, 128, 64, 32, 16, 8), cap=1024)]
    th_cands = [H] + [c for c in (4096, 2048, 1024, 512, 256, 128)
                      if c < H and H % c == 0]
    if tm_override is not None:
        tm_cands = [tm_override]
    if th_override is not None:
        th_cands = [th_override]

    def vmem_estimate(tm, th):
        rows = tm * D * (2 * x_bytes + 2 * x_bytes + 2 + 4)   # in + out (dbl buf) + xln + acc
        weights = 2 * D * th * 2 + 2 * th * D * 2             # W1 + W2 bf16, dbl buffered
        vecs = 2 * 8 * (3 * D + th) * 4                       # biases / LN vectors (padded)
        return rows + weights + vecs

    # Prefer full weight residency (largest th), then the largest row tile;
    # keep >= 2 steps on the parallel row axis when possible (v7x has 2 TCs).
    for prefer_two_steps in (True, False):
        for th in th_cands:
            for tm in tm_cands:
                if prefer_two_steps and M // tm < 2 and M > tm_cands[-1]:
                    continue
                if vmem_estimate(tm, th) <= budget:
                    return tm, th
    return tm_cands[-1], th_cands[-1]


def _channel_ff(x2d, gp, bp, w1, b1, w2, b2, *, vmem_limit,
                tm_override=None, th_override=None):
    M, D = x2d.shape
    H = w1.shape[1]
    tm, th = _select_ff_tiles(M, D, H, x2d.dtype.itemsize, vmem_limit,
                              tm_override, th_override)

    return pl.pallas_call(
        _channel_ff_kernel,
        out_shape=jax.ShapeDtypeStruct((M, D), x2d.dtype),
        grid=(M // tm, H // th),
        in_specs=[
            pl.BlockSpec((tm, D), lambda m, h: (m, 0)),     # x1 tile (LN input + residual)
            pl.BlockSpec((1, D), lambda m, h: (0, 0)),      # patch LN gamma
            pl.BlockSpec((1, D), lambda m, h: (0, 0)),      # patch LN beta
            pl.BlockSpec((D, th), lambda m, h: (0, h)),     # W1 panel/tile (bf16)
            pl.BlockSpec((1, th), lambda m, h: (0, h)),     # b1
            pl.BlockSpec((th, D), lambda m, h: (h, 0)),     # W2 panel/tile (bf16)
            pl.BlockSpec((1, D), lambda m, h: (0, 0)),      # b2
        ],
        out_specs=pl.BlockSpec((tm, D), lambda m, h: (m, 0)),
        scratch_shapes=[pltpu.VMEM((tm, D), jnp.bfloat16),   # LN(x1), cached across H tiles
                        pltpu.VMEM((tm, D), jnp.float32)],   # f32 output accumulator
        compiler_params=pltpu.CompilerParams(
            dimension_semantics=("parallel", "arbitrary"),
            vmem_limit_bytes=vmem_limit),
    )(x2d, gp, bp, w1, b1, w2, b2)


# ---------------------------------------------------------------------------
# Wrapper
# ---------------------------------------------------------------------------
def prepare_mixer_params(params, causal=True):
    """One-time parameter prep (hoisted out of the per-forward path): tril
    masking of the token-mix weight, bf16 casts of matmul operands, and 2-D
    reshapes of the broadcast vectors."""
    T = params["wc"].shape[0]
    D, H = params["w1"].shape
    wc = jnp.tril(params["wc"]) if causal else params["wc"]
    f32 = jnp.float32
    return dict(
        wc=wc.astype(jnp.bfloat16),
        bc=params["bc"].reshape(T, 1).astype(f32),
        gs=params["gs"].reshape(1, D).astype(f32),
        bs=params["bs"].reshape(1, D).astype(f32),
        gp=params["gp"].reshape(1, D).astype(f32),
        bp=params["bp"].reshape(1, D).astype(f32),
        w1=params["w1"].astype(jnp.bfloat16),
        b1=params["b1"].reshape(1, H).astype(f32),
        w2=params["w2"].astype(jnp.bfloat16),
        b2=params["b2"].reshape(1, D).astype(f32),
    )


def mixer_block(x, prepped, *, tm_override=None, th_override=None):
    """MixerBlock forward (n_heads=0, causal) with prepared params."""
    if x.ndim == 4:                      # 'b p t f -> (b p) t f'
        b, p, t, f = x.shape
        x = x.reshape(b * p, t, f)
    B, T, D = x.shape
    vmem_limit = _vmem_budget_bytes()

    x1 = _token_mix(x, prepped["wc"], prepped["bc"], prepped["gs"], prepped["bs"],
                    vmem_limit=vmem_limit)
    out = _channel_ff(x1.reshape(B * T, D), prepped["gp"], prepped["bp"],
                      prepped["w1"], prepped["b1"], prepped["w2"], prepped["b2"],
                      vmem_limit=vmem_limit,
                      tm_override=tm_override, th_override=th_override)
    return out.reshape(B, T, D)


def mixer_block_ref(x, params, causal=True):
    # Pure-JAX reference mirroring the PyTorch forward (f32, exact erf GELU).
    if x.ndim == 4:
        b, p, t, f = x.shape
        x = x.reshape(b * p, t, f)

    def ln(v, g, b):
        mu = v.mean(-1, keepdims=True)
        var = ((v - mu) ** 2).mean(-1, keepdims=True)
        return (v - mu) / jnp.sqrt(var + 1e-5) * g + b

    wc = jnp.tril(params["wc"]) if causal else params["wc"]
    residual = x
    h = ln(x, params["gs"], params["bs"])
    h = jnp.einsum("ij,bjd->bid", wc, h) + params["bc"][None, :, None]
    x1 = h + residual
    h2 = ln(x1, params["gp"], params["bp"])
    ff = jax.nn.gelu(h2 @ params["w1"] + params["b1"], approximate=False)
    ff = ff @ params["w2"] + params["b2"]
    return ff + x1


if __name__ == "__main__":
    def run_case(B, T, D, fold, atol, rtol, th_override=None):
        H = 4 * D
        key = jax.random.fold_in(jax.random.PRNGKey(0), fold)
        ks = jax.random.split(key, 11)
        f32 = jnp.float32
        params = dict(
            wc=0.1 * jax.random.normal(ks[0], (T, T), f32),      # Conv1d weight (kernel=1) as (T, T)
            bc=0.1 * jax.random.normal(ks[1], (T,), f32),        # Conv1d bias
            gs=1.0 + 0.1 * jax.random.normal(ks[2], (D,), f32),  # seq LayerNorm gamma
            bs=0.1 * jax.random.normal(ks[3], (D,), f32),        # seq LayerNorm beta
            gp=1.0 + 0.1 * jax.random.normal(ks[4], (D,), f32),  # patch LayerNorm gamma
            bp=0.1 * jax.random.normal(ks[5], (D,), f32),        # patch LayerNorm beta
            w1=jax.random.normal(ks[6], (D, H), f32) / jnp.sqrt(jnp.float32(D)),  # Linear(dim,4*dim).weight.T
            b1=0.1 * jax.random.normal(ks[7], (H,), f32),
            w2=jax.random.normal(ks[8], (H, D), f32) / jnp.sqrt(jnp.float32(H)),  # Linear(4*dim,dim).weight.T
            b2=0.1 * jax.random.normal(ks[9], (D,), f32),
        )
        x = jax.random.normal(ks[10], (B, T, D), f32)

        prepped = prepare_mixer_params(params, causal=True)
        out = mixer_block(x, prepped, th_override=th_override)
        jax.block_until_ready(out)

        ref = mixer_block_ref(x, params, causal=True)
        assert out.shape == ref.shape
        err = jnp.abs(out - ref)
        max_err = float(jnp.max(err))
        assert bool(jnp.all(err <= atol + rtol * jnp.abs(ref))), (
            f"case B={B} T={T} D={D}: max abs err {max_err}")

    # tiny shape implied by the module (single tile everywhere)
    run_case(B=2, T=8, D=32, fold=0, atol=5e-2, rtol=5e-2)
    # multi-row-tile shape: exercises LN-panel reuse across row tiles + resident weights
    run_case(B=2, T=512, D=128, fold=1, atol=5e-2, rtol=5e-2)
    # forced hidden-dim streaming path (th < H) in the channel-FF kernel
    run_case(B=2, T=8, D=64, fold=2, atol=5e-2, rtol=5e-2, th_override=128)

    print("KERNEL_OK")
</pallas_src>

<mosaic_0001>
module attributes {stable_mosaic.version = 11 : i64} {
  func.func @_token_mix_kernel(%arg0: i32, %arg1: i32, %arg2: memref<1x8x32xf32, #tpu.memory_space<vmem>>, %arg3: memref<8x8xbf16, #tpu.memory_space<vmem>>, %arg4: memref<8x1xf32, #tpu.memory_space<vmem>>, %arg5: memref<1x32xf32, #tpu.memory_space<vmem>>, %arg6: memref<1x32xf32, #tpu.memory_space<vmem>>, %arg7: memref<1x8x32xf32, #tpu.memory_space<vmem>>, %arg8: memref<8x32xbf16, #tpu.memory_space<vmem>>) attributes {dimension_semantics = [#tpu.dimension_semantics<parallel>, #tpu.dimension_semantics<arbitrary>], iteration_bounds = array<i64: 2, 1>, scalar_prefetch = 0 : i64, scratch_operands = 1 : i64, tpu.core_type = #tpu.core_type<tc>, window_params = [{transform_indices = @transform_0, window_bounds = array<i64: 1, 8, 32>}, {transform_indices = @transform_1, window_bounds = array<i64: 8, 8>}, {transform_indices = @transform_2, window_bounds = array<i64: 8, 1>}, {pipeline_mode = #tpu.pipeline_mode<synchronous>, transform_indices = @transform_3, window_bounds = array<i64: 1, 32>}, {pipeline_mode = #tpu.pipeline_mode<synchronous>, transform_indices = @transform_4, window_bounds = array<i64: 1, 32>}, {transform_indices = @transform_5, window_bounds = array<i64: 1, 8, 32>}]} {
    %c0_i32 = arith.constant 0 : i32
    %0 = arith.cmpi eq, %arg1, %c0_i32 : i32
    %1 = arith.extui %0 : i1 to i32
    %c0_i32_0 = arith.constant 0 : i32
    %2 = arith.cmpi ne, %1, %c0_i32_0 : i32
    scf.if %2 {
      %c0_11 = arith.constant 0 : index
      %c0_12 = arith.constant 0 : index
      %c0_13 = arith.constant 0 : index
      %18 = vector.load %arg2[%c0_11, %c0_12, %c0_13] : memref<1x8x32xf32, #tpu.memory_space<vmem>>, vector<1x8x32xf32>
      %19 = vector.shape_cast %18 : vector<1x8x32xf32> to vector<8x32xf32>
      %c0_14 = arith.constant 0 : index
      %c0_15 = arith.constant 0 : index
      %20 = vector.load %arg5[%c0_14, %c0_15] : memref<1x32xf32, #tpu.memory_space<vmem>>, vector<1x32xf32>
      %c0_16 = arith.constant 0 : index
      %c0_17 = arith.constant 0 : index
      %21 = vector.load %arg6[%c0_16, %c0_17] : memref<1x32xf32, #tpu.memory_space<vmem>>, vector<1x32xf32>
      %cst_18 = arith.constant dense<0.000000e+00> : vector<8xf32>
      %22 = vector.multi_reduction <add>, %19, %cst_18 [1] : vector<8x32xf32> to vector<8xf32>
      %23 = vector.shape_cast %22 : vector<8xf32> to vector<8x1xf32>
      %cst_19 = arith.constant 3.200000e+01 : f32
      %24 = vector.broadcast %cst_19 : f32 to vector<8x1xf32>
      %25 = arith.divf %23, %24 : vector<8x1xf32>
      %26 = vector.broadcast %25 : vector<8x1xf32> to vector<8x32xf32>
      %27 = arith.subf %19, %26 : vector<8x32xf32>
      %28 = arith.mulf %27, %27 : vector<8x32xf32>
      %cst_20 = arith.constant dense<0.000000e+00> : vector<8xf32>
      %29 = vector.multi_reduction <add>, %28, %cst_20 [1] : vector<8x32xf32> to vector<8xf32>
      %30 = vector.shape_cast %29 : vector<8xf32> to vector<8x1xf32>
      %cst_21 = arith.constant 3.200000e+01 : f32
      %31 = vector.broadcast %cst_21 : f32 to vector<8x1xf32>
      %32 = arith.divf %30, %31 : vector<8x1xf32>
      %33 = vector.broadcast %25 : vector<8x1xf32> to vector<8x32xf32>
      %34 = arith.subf %19, %33 : vector<8x32xf32>
      %cst_22 = arith.constant 9.99999974E-6 : f32
      %35 = vector.broadcast %cst_22 : f32 to vector<8x1xf32>
      %36 = arith.addf %32, %35 : vector<8x1xf32>
      %37 = math.rsqrt %36 : vector<8x1xf32>
      %38 = vector.broadcast %37 : vector<8x1xf32> to vector<8x32xf32>
      %39 = arith.mulf %34, %38 : vector<8x32xf32>
      %40 = vector.broadcast %20 : vector<1x32xf32> to vector<8x32xf32>
      %41 = arith.mulf %39, %40 : vector<8x32xf32>
      %42 = vector.broadcast %21 : vector<1x32xf32> to vector<8x32xf32>
      %43 = arith.addf %41, %42 : vector<8x32xf32>
      %44 = arith.truncf %43 : vector<8x32xf32> to vector<8x32xbf16>
      %c0_23 = arith.constant 0 : index
      %c0_24 = arith.constant 0 : index
      %45 = vector.load %arg8[%c0_23, %c0_24] : memref<8x32xbf16, #tpu.memory_space<vmem>>, vector<8x32xbf16>
      tpu.vector_store %arg8[%c0_23, %c0_24], %44 {strides = array<i32>} : memref<8x32xbf16, #tpu.memory_space<vmem>>, vector<8x32xbf16>,
    } else {
    }
    %c0 = arith.constant 0 : index
    %c0_1 = arith.constant 0 : index
    %3 = vector.load %arg3[%c0, %c0_1] : memref<8x8xbf16, #tpu.memory_space<vmem>>, vector<8x8xbf16>
    %c0_2 = arith.constant 0 : index
    %c0_3 = arith.constant 0 : index
    %4 = vector.load %arg8[%c0_2, %c0_3] : memref<8x32xbf16, #tpu.memory_space<vmem>>, vector<8x32xbf16>
    %cst = arith.constant dense<0.000000e+00> : vector<8x32xf32>
    %5 = tpu.matmul %3, %4, %cst {dimension_numbers = #tpu.dot_dimension_numbers<[1], [0], [0], [1], [0, 0, 1, 1], [], []>} : vector<8x8xbf16>, vector<8x32xbf16>, vector<8x32xf32> -> vector<8x32xf32>
    %c8_i32 = arith.constant 8 : i32
    %6 = arith.muli %arg1, %c8_i32 : i32
    %7 = tpu.assume_multiple %6, 8 : i32
    %c0_4 = arith.constant 0 : index
    %8 = arith.index_cast %7 : i32 to index
    %c0_5 = arith.constant 0 : index
    %9 = vector.load %arg2[%c0_4, %8, %c0_5] : memref<1x8x32xf32, #tpu.memory_space<vmem>>, vector<1x8x32xf32>
    %10 = vector.shape_cast %9 : vector<1x8x32xf32> to vector<8x32xf32>
    %c0_6 = arith.constant 0 : index
    %c0_7 = arith.constant 0 : index
    %11 = vector.load %arg4[%c0_6, %c0_7] : memref<8x1xf32, #tpu.memory_space<vmem>>, vector<8x1xf32>
    %12 = vector.broadcast %11 : vector<8x1xf32> to vector<8x32xf32>
    %13 = arith.addf %5, %12 : vector<8x32xf32>
    %14 = arith.addf %13, %10 : vector<8x32xf32>
    %c0_8 = arith.constant 0 : index
    %c0_9 = arith.constant 0 : index
    %c0_10 = arith.constant 0 : index
    %15 = vector.load %arg7[%c0_8, %c0_9, %c0_10] : memref<1x8x32xf32, #tpu.memory_space<vmem>>, vector<1x8x32xf32>
    %16 = vector.shape_cast %15 : vector<1x8x32xf32> to vector<8x32xf32>
    %17 = vector.shape_cast %14 : vector<8x32xf32> to vector<1x8x32xf32>
    tpu.vector_store %arg7[%c0_8, %c0_9, %c0_10], %17 {strides = array<i32>} : memref<1x8x32xf32, #tpu.memory_space<vmem>>, vector<1x8x32xf32>,
    return
  }
  func.func @transform_0(%arg0: i32, %arg1: i32) -> (i32, i32, i32) {
    %c0_i32 = arith.constant 0 : i32
    %c0_i32_0 = arith.constant 0 : i32
    %c0_i32_1 = arith.constant 0 : i32
    return %arg0, %c0_i32, %c0_i32_0 : i32, i32, i32
  }
  func.func @transform_1(%arg0: i32, %arg1: i32) -> (i32, i32) {
    %c0_i32 = arith.constant 0 : i32
    %c0_i32_0 = arith.constant 0 : i32
    return %arg1, %c0_i32 : i32, i32
  }
  func.func @transform_2(%arg0: i32, %arg1: i32) -> (i32, i32) {
    %c0_i32 = arith.constant 0 : i32
    %c0_i32_0 = arith.constant 0 : i32
    return %arg1, %c0_i32 : i32, i32
  }
  func.func @transform_3(%arg0: i32, %arg1: i32) -> (i32, i32) {
    %c0_i32 = arith.constant 0 : i32
    %c0_i32_0 = arith.constant 0 : i32
    %c0_i32_1 = arith.constant 0 : i32
    return %c0_i32, %c0_i32_0 : i32, i32
  }
  func.func @transform_4(%arg0: i32, %arg1: i32) -> (i32, i32) {
    %c0_i32 = arith.constant 0 : i32
    %c0_i32_0 = arith.constant 0 : i32
    %c0_i32_1 = arith.constant 0 : i32
    return %c0_i32, %c0_i32_0 : i32, i32
  }
  func.func @transform_5(%arg0: i32, %arg1: i32) -> (i32, i32, i32) {
    %c0_i32 = arith.constant 0 : i32
    %c0_i32_0 = arith.constant 0 : i32
    return %arg0, %arg1, %c0_i32 : i32, i32, i32
  }
}

</mosaic_0001>

<bundles_post_ra>
// kernel: tpu_custom_call.1
= control target key start
LH: loop header
LB: loop body
LE: loop exit
PB: predicated region body
PF: predicated region fallthrough
CT: control target
= control target key end

     0   :  { %10 = vsyncpa [#allocation4], 0  ;;  %s951_s0 = inlined_call_operand.hbm [shape: f32[2,8,32], index: 0, kind: input, shape index: {}]   ;;  %s952_s1 = inlined_call_operand.vmem [shape: bf16[8,8], index: 1, kind: input, shape index: {}]   ;;  %s953_s2 = inlined_call_operand.vmem [shape: f32[8,1], index: 2, kind: input, shape index: {}]   ;;  %s954_s3 = inlined_call_operand.vmem [shape: f32[1,32], index: 3, kind: input, shape index: {}]   ;;  %s955_s4 = inlined_call_operand.vmem [shape: f32[1,32], index: 4, kind: input, shape index: {}]   ;;  %s956_s5 = inlined_call_operand.hbm [shape: f32[2,8,32], index: 5, kind: output, shape index: {}]  }
   0x1   :  { %12 = vsyncpa [#allocation4 + $0x1], 0 }
   0x2   :  { %13 = vsyncpa [#allocation5], 0 }
   0x3   :  { %15 = vsyncpa [#allocation5 + $0x1], 0  ;;  %s760_s18 = smov 0   ;;  %s762_s19 = smov 0  }
   0x4   :  { %s764_s20 = smov 0   ;;  %s766_s21 = smov 0  }
   0x5   :  { %s768_s22 = smov 0   ;;  %s770_s23 = smov 0  }
   0x6 LB: > { %s516_s24 = sadd.s32 4294967295, %s723_s23   ;;  %s517_s25 = sadd.s32 4294967294, %s723_s23   ;;  %s723_s23 = sphi %s770_s23, %s21_s23   ;;  %s719_s22 = sphi %s768_s22, %s972_s22   ;;  %s715_s21 = sphi %s766_s21, %s971_s21   ;;  %s711_s20 = sphi %s764_s20, %s970_s20   ;;  %s707_s19 = sphi %s762_s19, %s969_s19   ;;  %s703_s18 = sphi %s760_s18, %s968_s18  }
   0x7   : > { %s33_s26 = sadd.s32 1, %s719_s22  ;;  %s40_s27 = sadd.s32 1, %s711_s20 }
   0x8   : > { %p35_p0 = scmp.ge.s32.totalorder %s33_s26, 2  ;;  %p47_p1 = scmp.ne.s32.totalorder %s711_s20, %s707_s19 }
   0x9   : > { %p48_p2 = scmp.eq.s32.totalorder %s723_s23, 0  ;;  %p53_p3 = scmp.ne.s32.totalorder %s707_s19, %s703_s18 }
   0xa   : > { %s974_s26 = smov (%p35_p0, %s33_s26), 0  ;;  %p54_p5 = scmp.eq.s32.totalorder %s516_s24, 0 }
   0xb   : > { %p801_p4 = por %p48_p2, %p47_p1  ;;  %s37_s29 = ssub.s32 %s719_s22, %s974_s26 }
   0xc   : > { %p173_p6 = scmp.eq.s32.totalorder %s516_s24, 1  ;;  %p38_p7 = scmp.eq.s32.totalorder %s37_s29, 0 }
   0xd   : > { %p807_p8 = por %p54_p5, %p53_p3  ;;  %p179_p10 = scmp.eq.s32.totalorder %s517_s25, 1 }
   0xe   : > { %p811_p9 = por %p173_p6, %p47_p1  ;;  %p554_p13 = scmp.lt.s32.totalorder %s723_s23, 2 }
   0xf   : > { %s816_s7 = scalar_select %p38_p7, %s711_s20, %s40_s27  }
  0x10   : > { %s960_s6 = scalar_select %p811_p9, 1, 0 }
  0x11   : > { %p818_p11 = por %p179_p10, %p53_p3  ;;  %s219_s9 = sand.u32 1, %s711_s20  }
  0x12   : > { %s522_s10 = sshll.u32 %s219_s9, 3  ;;  %s523_s11 = sshll.u32 %s719_s22, 7 }
  0x13   : > { %s961_s8 = scalar_select %p818_p11, 1, 0 }
  0x14   : > { %s829_s14 = scalar_lea.hbm %s951_s0, %s523_s11  ;;  %s223_s15 = scalar_lea.vmem [#allocation3], %s522_s10 }
  0x15   : > { %s230_s16 = sshll.u32 %s223_s15, 4  ;;  %p835_p0 = pnand %p554_p13, %p801_p4  ;;  %s831_s16 = int_to_ptr.vmem [resolvable:$true] %s230_s16 }
  0x16   : > { %s220_s24 = scalar_lea.sflag [#allocation4], %s219_s9  ;;  %s611_s25 = scalar_lea.hbm %s829_s14, 128 }
  0x17   : > { %p612_p3 = scmp.ne.s32.totalorder %s829_s14, %s611_s25  ;;  %p613_p5 = pneg %p835_p0 }
  0x18   : > { %s616_s28 = scalar_lea.hbm %s951_s0, 256  ;;  %p617_p4 = scmp.lt.u32.totalorder %s829_s14, %s951_s0 }
  0x19   : > { %p614_p6 = pnand %p613_p5, %p612_p3  ;;  %p618_p10 = scmp.lt.u32.totalorder %s616_s28, %s611_s25 }
  0x1a   : > { %p620_p12 = scmp.lt.u32.totalorder %s611_s25, %s829_s14 }
  0x1b   : > { %p615_p7 = pneg %p614_p6  ;;  %p619_p13 = por %p618_p10, %p617_p4 }
  0x1d   : > { %p621_p1 = por %p620_p12, %p619_p13 }
  0x1f   : > { %p622_p2 = pnand %p621_p1, %p615_p7 }
  0x21   : > { %625 = shalt.err (!%p622_p2)
}
  0x22   : > { %s626_s9 = scalar_lea.vmem %s831_s16, 128  ;;  %s725_s12 = smov [#allocation3]  }
  0x23   : > { %p627_p3 = scmp.ne.s32.totalorder %s831_s16, %s626_s9  ;;  %s631_s13 = sshll.u32 %s725_s12, 4  ;;  %s632_s13 = int_to_ptr.vmem [resolvable:$false] %s631_s13 }
  0x24   : > { %s633_s15 = scalar_lea.vmem %s632_s13, 256  ;;  %p634_p9 = scmp.lt.s32.totalorder %s831_s16, %s632_s13 }
  0x25   : > { %p629_p6 = pnand %p627_p3, %p613_p5  ;;  %p635_p4 = scmp.lt.s32.totalorder %s633_s15, %s626_s9 }
  0x27   : > { %p630_p11 = pneg %p629_p6  ;;  %p636_p10 = por %p635_p4, %p634_p9 }
  0x29   : > { %p637_p12 = pnand %p636_p10, %p630_p11 }
  0x2b   : > { %640 = shalt.err (!%p637_p12)
}
  0x2c   : > { %549 = dma.hbm_to_vmem [thread:$0]  (!%p835_p0), %s829_s14, 128, %s831_s16, %s220_s24  }
  0x2d   : > { %p963_p1 = scmp.lt.s32.totalorder %s723_s23, 3  ;;  %p964_p2 = scmp.ge.s32.totalorder %s723_s23, 1 }
  0x2f   : > { %p236_p5 = pnand %p964_p2, %p963_p1 }
  0x30   : > { %s871_s25 = sand.u32 (!%p236_p5), 1, %s707_s19  }
  0x31   : > { %239 = sbr.rel (%p236_p5) target bundleno = 615 (0x267), region = 40  ;;  %s525_s27 = sshll.u32 (!%p236_p5), %s871_s25, 3 }
  0x32   : > { %s242_s29 = scalar_lea.sflag (!%p236_p5), [#allocation4], %s871_s25  ;;  %s245_s17 = scalar_lea.vmem (!%p236_p5), [#allocation3], %s525_s27 }
  0x38   : > { %694 = dma.done.wait (%p807_p8), %s242_s29, 128  }
  0x39   : > { %696 = vsyncadd (%p807_p8), %s242_s29, 4294967168  ;;  %vm296_vm0 = vcmask 261120   ;;  %v293_v0 = vld [vmem:[%s245_s17] sm:$0xff]  ;;  %v726_v7 = vmov 0.0   ;;  %vm727_vm1 = vmmov 0   ;;  %v728_v9 = vmov 0  }
  0x3a   : > { %v297_v1 = vsel %vm296_vm0, %v293_v0, 0.0  ;;  %536 = vmatprep.subr.bf16.mxu0 %v726_v7  ;;  %538 = vmatprep.mubr.msk.bf16.mxu0 %vm727_vm1, %v726_v7  ;;  %v333_v8 = vld [vmem:[%s953_s2] sm:$0xff]  ;;  %vm326_vm2 = vcmask 257024   ;;  %vm343_vm3 = vcmask 1043456   ;;  %vm339_vm4 = vcmask 64512   ;;  %s531_s12 = sshll.u32 %s715_s21, 7 }
  0x3b   : > { %298 = vadd.xlane.f32.xlu0 %v297_v1  ;;  %607 = vset.pattern.permute.xlu1 %v728_v9  ;;  %v527_v14 = vld [vmem:[%s954_s3] ss:$0 sm:$0xff]  ;;  %s279_s13 = scalar_lea.vmem [#allocation6], %s525_s27  ;;  %s901_s14 = scalar_lea.hbm %s956_s5, %s531_s12 }
  0x3c   : > { %608 = vset.pattern.permute.xlu0 %v728_v9  ;;  %336 = vperm.xlu1 %607, %v333_v8   ;;  %v528_v16 = vld [vmem:[%s955_s4] ss:$0 sm:$0xff]  ;;  %s405_s15 = sshll.u32 %s279_s13, 4  ;;  %s391_s21 = scalar_lea.sflag [#allocation5], %s871_s25  ;;  %s903_s15 = int_to_ptr.vmem [resolvable:$true] %s405_s15 }
  0x3d   : > { %v328_v22 = vld [vmem:[%s952_s1] sm:$0xf]  ;;  %s641_s27 = scalar_lea.vmem %s903_s15, 128  ;;  %p965_p9 = scmp.ne.s32.totalorder %s960_s6, 0 }
  0x3e   : > { %p642_p8 = scmp.ne.s32.totalorder %s903_s15, %s641_s27  ;;  %s729_s16 = smov [#allocation6]  }
  0x3f   : > { %s645_s30 = sshll.u32 %s729_s16, 4  ;;  %s646_s30 = int_to_ptr.vmem [resolvable:$false] %s645_s30 }
  0x40   : > { %p643_p11 = pnand %p642_p8, %p965_p9  ;;  %s647_s24 = scalar_lea.vmem %s646_s30, 256 }
  0x41   : > { %p648_p7 = scmp.lt.s32.totalorder %s903_s15, %s646_s30  ;;  %p649_p13 = scmp.lt.s32.totalorder %s647_s24, %s641_s27 }
  0x42   : > { %p644_p0 = pneg %p643_p11 }
  0x43   : > { %p650_p3 = por %p649_p13, %p648_p7 }
  0x45   : > { %p651_p6 = pnand %p650_p3, %p644_p0 }
  0xbb   : > { %v337_v23 = vpop.permute.xlu1 %336 }
  0xc8   : > { %v299_v2 = vpop.xlane.xlu0 %298 }
  0xc9   : > { %v301_v3 = vmul.f32 0.03125, %v299_v2 }
  0xcb   : > { %v302_v4 = vsub.f32 %v293_v0, %v301_v3 }
  0xcd   : > { %v303_v5 = vmul.f32 %v302_v4, %v302_v4 }
  0xcf   : > { %v304_v6 = vsel %vm296_vm0, %v303_v5, 0.0 }
  0xd0   : > { %305 = vadd.xlane.f32.xlu0 %v304_v6 }
 0x15d   : > { %v306_v10 = vpop.xlane.xlu0 %305 }
 0x15e   : > { %v307_v11 = vmul.f32 0.03125, %v306_v10 }
 0x160   : > { %v308_v12 = vadd.f32 1e-05, %v307_v11 }
 0x162   : > { %609 = vrsqrt.f32 %v308_v12 }
 0x16c   : > { %v610_v13 = vpop.eup %609 }
 0x16d   : > { %v310_v15 = vmul.f32 %v610_v13, %v302_v4 }
 0x16f   : > { %v317_v17 = vmul.f32 %v527_v14, %v310_v15 }
 0x171   : > { %v324_v18 = vadd.f32 %v528_v16, %v317_v17 }
 0x173   : > { %v325_v19 = vpack.c.bf16 %v324_v18, %v324_v18 }
 0x175   : > { %327 = vst.msk [vmem:[#allocation2] sm:$0xf] %vm326_vm2, %v325_v19 }
 0x17c   : > { %v329_v20 = vld [vmem:[#allocation2] sm:$0xf] }
 0x17d   : > { %v345_v21 = vsel %vm343_vm3, %v329_v20, 0 }
 0x17e   : > { %537 = vmatpush3.bf16.msra.mxu0 %v345_v21 }
 0x181   : > { %539 = vmatmul.mubr.msk.bf16.vlgmr.msra.gmra.mrb[0].mxu0 %vm339_vm4, %v328_v22 }
 0x254   : > { %v381_v24 = vpop.f32.mrb[0].mxu0 }
 0x255   : > { %v382_v25 = vadd.f32 %v381_v24, %v337_v23  ;;  %v540_v26 = vpop.f32.mrb[1].mxu0 }
 0x256   : > { %v384_v27 = vpop.f32.mrb[2].mxu0 }
 0x257   : > { %v387_v28 = vadd.f32 %v382_v25, %v293_v0  ;;  %v541_v29 = vpop.f32.mrb[3].mxu0 }
 0x259   : > { %389 = vst.msk [vmem:[%s279_s13] sm:$0xff] %vm296_vm0, %v387_v28 }
 0x25a   : > { %654 = shalt.err (!%p651_p6)
}
 0x25b   : > { %s655_s25 = scalar_lea.hbm %s901_s14, 128  ;;  %s659_s11 = scalar_lea.hbm %s956_s5, 256 }
 0x25c   : > { %p656_p4 = scmp.ne.s32.totalorder %s901_s14, %s655_s25  ;;  %p660_p1 = scmp.lt.u32.totalorder %s901_s14, %s956_s5 }
 0x25d   : > { %p661_p2 = scmp.lt.u32.totalorder %s659_s11, %s655_s25  ;;  %p663_p8 = scmp.lt.u32.totalorder %s655_s25, %s901_s14 }
 0x25e   : > { %p657_p10 = pnand %p656_p4, %p965_p9 }
 0x25f   : > { %p662_p5 = por %p661_p2, %p660_p1 }
 0x260   : > { %p658_p12 = pneg %p657_p10 }
 0x261   : > { %p664_p11 = por %p663_p8, %p662_p5 }
 0x263   : > { %p665_p0 = pnand %p664_p11, %p658_p12 }
 0x265   : > { %668 = shalt.err (!%p665_p0)
}
 0x266   : > { %544 = dma.vmem_to_hbm [thread:$0]  (%p965_p9), %s903_s15, 128, %s901_s14, %s391_s21  }
 0x267 PF: > { %s417_s13 = sand.u32 1, %s703_s18   ;;  %p966_p7 = scmp.ne.s32.totalorder %s961_s8, 0 }
 0x268   : > { %p967_p13 = scmp.ge.s32.totalorder %s723_s23, 2  ;;  %s418_s29 = scalar_lea.sflag [#allocation5], %s417_s13 }
 0x26a   : > { %p551_p3 = pnand %p967_p13, %p966_p7 }
 0x26c   : > { %698 = dma.done.wait (!%p551_p3), %s418_s29, 128  }
 0x26d   : > { %700 = vsyncadd (!%p551_p3), %s418_s29, 4294967168  ;;  %s21_s23 = sadd.s32 1, %s723_s23   ;;  %s968_s18 = smov %s707_s19 }
 0x26e   : > { %p18_p6 = scmp.ge.s32.totalorder %s21_s23, 4   ;;  %s969_s19 = smov %s711_s20 }
 0x26f   : > { %s970_s20 = smov %s816_s7  ;;  %s971_s21 = smov %s719_s22 }
 0x270   : > { %s972_s22 = smov %s974_s26  ;;  %20 = sbr.rel (!%p18_p6) target bundleno = 6 (0x6), region = 96 }
 0x277   :  { %423 = vsyncpa [#allocation4], 1 }
 0x278   :  { %425 = vsyncpa [#allocation4 + $0x1], 1 }
 0x279   :  { %426 = vsyncpa [#allocation5], 1 }
 0x27a   :  { %428 = vsyncpa [#allocation5 + $0x1], 1 }

</bundles_post_ra>
